<compile_context>
chip_gen: v7x
topology: tpu7x:2x2x1
jax: 0.10.0
libtpu: 0.0.40
codegen_flags: <defaults>
</compile_context>

<pallas_src>
import functools

import jax
import jax.numpy as jnp
from jax.experimental import pallas as pl
from jax.experimental.pallas import tpu as pltpu


def _round_up(n, m):
    return ((n + m - 1) // m) * m


def _num_tensorcores():
    """v7x exposes 2 TensorCores per chip behind one device; earlier gens 1."""
    try:
        kind = jax.devices()[0].device_kind.lower().replace(" ", "")
        if "v7" in kind or "tpu7" in kind:
            return 2
    except Exception:
        pass
    return 1


def _actor_kernel(x_ref, w1_ref, b1_ref, w2_ref, b2_ref, w3_ref, b3_ref,
                  o_ref, *, max_action):
    # x_ref: (TB, S) bf16.  Weights (in, out) bf16, biases f32.  All matmuls
    # accumulate in f32 on the MXU; bias/ReLU on the VPU, tanh on the EUP.
    # All hidden/output dims are padded to multiples of 128 (lane-dense).
    x = x_ref[...]

    # Layer 1: Linear(state_dim, 400->512) + ReLU
    h1 = jnp.dot(x, w1_ref[...], preferred_element_type=jnp.float32)
    h1 = jnp.maximum(h1 + b1_ref[...], 0.0)

    # Layer 2: Linear(512, 300->384) + ReLU (padded rows of W2 are zero)
    h2 = jnp.dot(h1.astype(w2_ref.dtype), w2_ref[...],
                 preferred_element_type=jnp.float32)
    h2 = jnp.maximum(h2 + b2_ref[...], 0.0)

    # Layer 3: Linear(384, action_dim->128) + Tanh, scaled by max_action.
    h3 = jnp.dot(h2.astype(w3_ref.dtype), w3_ref[...],
                 preferred_element_type=jnp.float32)
    h3 = h3 + b3_ref[...]
    o_ref[...] = (max_action * jnp.tanh(h3)).astype(o_ref.dtype)


def prepare_actor_params(params, *, compute_dtype=jnp.bfloat16):
    """Cast/pad params into kernel layout ONCE (bf16 weights, lane-dense dims).

    Padded rows/cols are zero-filled so padded K columns contribute nothing to
    the layer-2/3 accumulations and padded output lanes stay exactly tanh(0)=0.
    """
    w1, b1 = params["W1"], params["b1"]
    w2, b2 = params["W2"], params["b2"]
    w3, b3 = params["W3"], params["b3"]
    state_dim, h1 = w1.shape
    _, h2 = w2.shape
    _, action_dim = w3.shape

    H1P = _round_up(h1, 128)                 # 400 -> 512
    H2P = _round_up(h2, 128)                 # 300 -> 384
    OUT = _round_up(max(action_dim, 1), 128)  # e.g. 4 -> 128

    def pad2(a, r, c, dtype):
        return jnp.pad(a, ((0, r - a.shape[0]), (0, c - a.shape[1]))).astype(dtype)

    return {
        "W1": pad2(w1, state_dim, H1P, compute_dtype),
        "b1": pad2(b1, 1, H1P, jnp.float32),
        "W2": pad2(w2, H1P, H2P, compute_dtype),
        "b2": pad2(b2, 1, H2P, jnp.float32),
        "W3": pad2(w3, H2P, OUT, compute_dtype),
        "b3": pad2(b3, 1, OUT, jnp.float32),
        "action_dim": int(action_dim),
        "state_dim": int(state_dim),
    }


def actor_forward(state, prep, max_action=1.0):
    """state: (B, state_dim) f32. prep: output of prepare_actor_params()."""
    w1, b1 = prep["W1"], prep["b1"]
    w2, b2 = prep["W2"], prep["b2"]
    w3, b3 = prep["W3"], prep["b3"]
    action_dim = prep["action_dim"]

    B, S = state.shape
    assert S == w1.shape[0], "state_dim mismatch with prepared params"
    H1P, H2P, OUT = w1.shape[1], w2.shape[1], w3.shape[1]
    compute_dtype = w1.dtype
    out_dtype = state.dtype

    # --- Batch tiling: multiple of 16 rows (bf16 packing), balanced so B_pad
    # overshoots B by at most one tile; on v7x force >=2 grid steps when the
    # batch is big enough so the "parallel" axis spans both TensorCores.
    min_steps = max(1, pl.cdiv(B, 256))
    n_cores = _num_tensorcores()
    if n_cores > 1 and B >= 32:
        min_steps = max(min_steps, n_cores)
    TB = _round_up(pl.cdiv(max(B, 1), min_steps), 16)
    B_pad = _round_up(B, TB)
    grid = (B_pad // TB,)

    x_p = state
    if B_pad != B:
        x_p = jnp.pad(x_p, ((0, B_pad - B), (0, 0)))
    x_p = x_p.astype(compute_dtype)

    kernel = functools.partial(_actor_kernel, max_action=float(max_action))

    # Weights/biases: constant block index -> resident in VMEM, no re-DMA.
    # (If the MLP is ever scaled up, single-buffer these via
    #  pipeline_mode=pl.Buffered(1) to halve their VMEM footprint.)
    def const(shape):
        return pl.BlockSpec(shape, lambda i: (0,) * len(shape))

    out = pl.pallas_call(
        kernel,
        out_shape=jax.ShapeDtypeStruct((B_pad, OUT), jnp.float32),
        grid=grid,
        in_specs=[
            pl.BlockSpec((TB, S), lambda i: (i, 0)),      # x: streamed over batch
            const((S, H1P)), const((1, H1P)),
            const((H1P, H2P)), const((1, H2P)),
            const((H2P, OUT)), const((1, OUT)),
        ],
        out_specs=pl.BlockSpec((TB, OUT), lambda i: (i, 0)),
        compiler_params=pltpu.CompilerParams(
            dimension_semantics=("parallel",)),
    )(x_p, w1, b1, w2, b2, w3, b3)

    return out[:B, :action_dim].astype(out_dtype)


def init_actor_params(key, state_dim, action_dim):
    """Deterministic init mimicking PyTorch nn.Linear default (U[-1/sqrt(fan_in), +])."""
    ks = jax.random.split(key, 6)

    def lin(kw, kb, fan_in, fan_out):
        bound = 1.0 / jnp.sqrt(jnp.float32(fan_in))
        W = jax.random.uniform(kw, (fan_in, fan_out), jnp.float32, -bound, bound)
        b = jax.random.uniform(kb, (1, fan_out), jnp.float32, -bound, bound)
        return W, b

    W1, b1 = lin(ks[0], ks[1], state_dim, 400)
    W2, b2 = lin(ks[2], ks[3], 400, 300)
    W3, b3 = lin(ks[4], ks[5], 300, action_dim)
    return {"W1": W1, "b1": b1, "W2": W2, "b2": b2, "W3": W3, "b3": b3}


if __name__ == "__main__":
    key = jax.random.PRNGKey(0)
    k_params, k_state = jax.random.split(key)

    # Small shapes consistent with the module: env-style obs/action dims.
    batch, state_dim, action_dim, max_action = 2, 16, 4, 1.0

    params = init_actor_params(k_params, state_dim, action_dim)
    prep = prepare_actor_params(params)   # cast/pad ONCE, reuse across calls
    state = jax.random.normal(k_state, (batch, state_dim), jnp.float32)

    out = actor_forward(state, prep, max_action)
    out = jax.block_until_ready(out)
    assert out.shape == (batch, action_dim)

    # Reference 1: identical bf16-weight / f32-accumulate math in plain JAX.
    cd = jnp.bfloat16
    xw = state.astype(cd)
    h1 = jnp.maximum(
        jnp.dot(xw, params["W1"].astype(cd),
                preferred_element_type=jnp.float32) + params["b1"], 0.0)
    h2 = jnp.maximum(
        jnp.dot(h1.astype(cd), params["W2"].astype(cd),
                preferred_element_type=jnp.float32) + params["b2"], 0.0)
    ref_bf16 = max_action * jnp.tanh(
        jnp.dot(h2.astype(cd), params["W3"].astype(cd),
                preferred_element_type=jnp.float32) + params["b3"])
    assert jnp.allclose(out, ref_bf16, atol=1e-4, rtol=1e-4)

    # Reference 2: full-f32 PyTorch-equivalent math (loose tol: bf16 MXU inputs).
    r = jnp.maximum(state @ params["W1"] + params["b1"], 0.0)
    r = jnp.maximum(r @ params["W2"] + params["b2"], 0.0)
    ref_f32 = max_action * jnp.tanh(r @ params["W3"] + params["b3"])
    assert jnp.allclose(out, ref_f32, atol=3e-2, rtol=3e-2)

    print("KERNEL_OK")
</pallas_src>

<mosaic_0001>
module attributes {stable_mosaic.version = 11 : i64} {
  func.func @_actor_kernel(%arg0: i32, %arg1: memref<16x16xbf16, #tpu.memory_space<vmem>>, %arg2: memref<16x512xbf16, #tpu.memory_space<vmem>>, %arg3: memref<1x512xf32, #tpu.memory_space<vmem>>, %arg4: memref<512x384xbf16, #tpu.memory_space<vmem>>, %arg5: memref<1x384xf32, #tpu.memory_space<vmem>>, %arg6: memref<384x128xbf16, #tpu.memory_space<vmem>>, %arg7: memref<1x128xf32, #tpu.memory_space<vmem>>, %arg8: memref<16x128xf32, #tpu.memory_space<vmem>>) attributes {dimension_semantics = [#tpu.dimension_semantics<parallel>], iteration_bounds = array<i64: 1>, scalar_prefetch = 0 : i64, scratch_operands = 0 : i64, tpu.core_type = #tpu.core_type<tc>, window_params = [{transform_indices = @transform_0, window_bounds = array<i64: 16, 16>}, {pipeline_mode = #tpu.pipeline_mode<synchronous>, transform_indices = @transform_1, window_bounds = array<i64: 16, 512>}, {pipeline_mode = #tpu.pipeline_mode<synchronous>, transform_indices = @transform_2, window_bounds = array<i64: 1, 512>}, {pipeline_mode = #tpu.pipeline_mode<synchronous>, transform_indices = @transform_3, window_bounds = array<i64: 512, 384>}, {pipeline_mode = #tpu.pipeline_mode<synchronous>, transform_indices = @transform_4, window_bounds = array<i64: 1, 384>}, {pipeline_mode = #tpu.pipeline_mode<synchronous>, transform_indices = @transform_5, window_bounds = array<i64: 384, 128>}, {pipeline_mode = #tpu.pipeline_mode<synchronous>, transform_indices = @transform_6, window_bounds = array<i64: 1, 128>}, {transform_indices = @transform_7, window_bounds = array<i64: 16, 128>}]} {
    %c0 = arith.constant 0 : index
    %c0_0 = arith.constant 0 : index
    %0 = vector.load %arg1[%c0, %c0_0] : memref<16x16xbf16, #tpu.memory_space<vmem>>, vector<16x16xbf16>
    %c0_1 = arith.constant 0 : index
    %c0_2 = arith.constant 0 : index
    %1 = vector.load %arg2[%c0_1, %c0_2] : memref<16x512xbf16, #tpu.memory_space<vmem>>, vector<16x512xbf16>
    %cst = arith.constant dense<0.000000e+00> : vector<16x512xf32>
    %2 = tpu.matmul %0, %1, %cst {dimension_numbers = #tpu.dot_dimension_numbers<[1], [0], [0], [1], [0, 0, 1, 1], [], []>} : vector<16x16xbf16>, vector<16x512xbf16>, vector<16x512xf32> -> vector<16x512xf32>
    %c0_3 = arith.constant 0 : index
    %c0_4 = arith.constant 0 : index
    %3 = vector.load %arg3[%c0_3, %c0_4] : memref<1x512xf32, #tpu.memory_space<vmem>>, vector<1x512xf32>
    %4 = vector.broadcast %3 : vector<1x512xf32> to vector<16x512xf32>
    %5 = arith.addf %2, %4 : vector<16x512xf32>
    %cst_5 = arith.constant 0.000000e+00 : f32
    %6 = vector.broadcast %cst_5 : f32 to vector<16x512xf32>
    %7 = arith.maximumf %5, %6 : vector<16x512xf32>
    %8 = arith.truncf %7 : vector<16x512xf32> to vector<16x512xbf16>
    %c0_6 = arith.constant 0 : index
    %c0_7 = arith.constant 0 : index
    %9 = vector.load %arg4[%c0_6, %c0_7] : memref<512x384xbf16, #tpu.memory_space<vmem>>, vector<512x384xbf16>
    %cst_8 = arith.constant dense<0.000000e+00> : vector<16x384xf32>
    %10 = tpu.matmul %8, %9, %cst_8 {dimension_numbers = #tpu.dot_dimension_numbers<[1], [0], [0], [1], [0, 0, 1, 1], [], []>} : vector<16x512xbf16>, vector<512x384xbf16>, vector<16x384xf32> -> vector<16x384xf32>
    %c0_9 = arith.constant 0 : index
    %c0_10 = arith.constant 0 : index
    %11 = vector.load %arg5[%c0_9, %c0_10] : memref<1x384xf32, #tpu.memory_space<vmem>>, vector<1x384xf32>
    %12 = vector.broadcast %11 : vector<1x384xf32> to vector<16x384xf32>
    %13 = arith.addf %10, %12 : vector<16x384xf32>
    %cst_11 = arith.constant 0.000000e+00 : f32
    %14 = vector.broadcast %cst_11 : f32 to vector<16x384xf32>
    %15 = arith.maximumf %13, %14 : vector<16x384xf32>
    %16 = arith.truncf %15 : vector<16x384xf32> to vector<16x384xbf16>
    %c0_12 = arith.constant 0 : index
    %c0_13 = arith.constant 0 : index
    %17 = vector.load %arg6[%c0_12, %c0_13] : memref<384x128xbf16, #tpu.memory_space<vmem>>, vector<384x128xbf16>
    %cst_14 = arith.constant dense<0.000000e+00> : vector<16x128xf32>
    %18 = tpu.matmul %16, %17, %cst_14 {dimension_numbers = #tpu.dot_dimension_numbers<[1], [0], [0], [1], [0, 0, 1, 1], [], []>} : vector<16x384xbf16>, vector<384x128xbf16>, vector<16x128xf32> -> vector<16x128xf32>
    %c0_15 = arith.constant 0 : index
    %c0_16 = arith.constant 0 : index
    %19 = vector.load %arg7[%c0_15, %c0_16] : memref<1x128xf32, #tpu.memory_space<vmem>>, vector<1x128xf32>
    %20 = vector.broadcast %19 : vector<1x128xf32> to vector<16x128xf32>
    %21 = arith.addf %18, %20 : vector<16x128xf32>
    %22 = math.tanh %21 : vector<16x128xf32>
    %cst_17 = arith.constant 1.000000e+00 : f32
    %23 = vector.broadcast %cst_17 : f32 to vector<16x128xf32>
    %24 = arith.mulf %23, %22 : vector<16x128xf32>
    %c0_18 = arith.constant 0 : index
    %c0_19 = arith.constant 0 : index
    %25 = vector.load %arg8[%c0_18, %c0_19] : memref<16x128xf32, #tpu.memory_space<vmem>>, vector<16x128xf32>
    tpu.vector_store %arg8[%c0_18, %c0_19], %24 {strides = array<i32>} : memref<16x128xf32, #tpu.memory_space<vmem>>, vector<16x128xf32>,
    return
  }
  func.func @transform_0(%arg0: i32) -> (i32, i32) {
    %c0_i32 = arith.constant 0 : i32
    %c0_i32_0 = arith.constant 0 : i32
    return %arg0, %c0_i32 : i32, i32
  }
  func.func @transform_1(%arg0: i32) -> (i32, i32) {
    %c0_i32 = arith.constant 0 : i32
    %c0_i32_0 = arith.constant 0 : i32
    %c0_i32_1 = arith.constant 0 : i32
    return %c0_i32, %c0_i32_0 : i32, i32
  }
  func.func @transform_2(%arg0: i32) -> (i32, i32) {
    %c0_i32 = arith.constant 0 : i32
    %c0_i32_0 = arith.constant 0 : i32
    %c0_i32_1 = arith.constant 0 : i32
    return %c0_i32, %c0_i32_0 : i32, i32
  }
  func.func @transform_3(%arg0: i32) -> (i32, i32) {
    %c0_i32 = arith.constant 0 : i32
    %c0_i32_0 = arith.constant 0 : i32
    %c0_i32_1 = arith.constant 0 : i32
    return %c0_i32, %c0_i32_0 : i32, i32
  }
  func.func @transform_4(%arg0: i32) -> (i32, i32) {
    %c0_i32 = arith.constant 0 : i32
    %c0_i32_0 = arith.constant 0 : i32
    %c0_i32_1 = arith.constant 0 : i32
    return %c0_i32, %c0_i32_0 : i32, i32
  }
  func.func @transform_5(%arg0: i32) -> (i32, i32) {
    %c0_i32 = arith.constant 0 : i32
    %c0_i32_0 = arith.constant 0 : i32
    %c0_i32_1 = arith.constant 0 : i32
    return %c0_i32, %c0_i32_0 : i32, i32
  }
  func.func @transform_6(%arg0: i32) -> (i32, i32) {
    %c0_i32 = arith.constant 0 : i32
    %c0_i32_0 = arith.constant 0 : i32
    %c0_i32_1 = arith.constant 0 : i32
    return %c0_i32, %c0_i32_0 : i32, i32
  }
  func.func @transform_7(%arg0: i32) -> (i32, i32) {
    %c0_i32 = arith.constant 0 : i32
    %c0_i32_0 = arith.constant 0 : i32
    return %arg0, %c0_i32 : i32, i32
  }
}

</mosaic_0001>

<bundles_post_ra>
// kernel: tpu_custom_call.1
= control target key start
LH: loop header
LB: loop body
LE: loop exit
PB: predicated region body
PF: predicated region fallthrough
CT: control target
= control target key end

     0   :  { %12 = vsyncpa [#allocation3], 0  ;;  %s2066_s0 = inlined_call_operand.hbm [shape: bf16[16,16], index: 0, kind: input, shape index: {}]   ;;  %s2067_s1 = inlined_call_operand.hbm [shape: bf16[16,512], index: 1, kind: input, shape index: {}]   ;;  %s2068_s2 = inlined_call_operand.vmem [shape: f32[1,512], index: 2, kind: input, shape index: {}]   ;;  %s2069_s3 = inlined_call_operand.hbm [shape: bf16[512,384], index: 3, kind: input, shape index: {}]   ;;  %s2070_s4 = inlined_call_operand.vmem [shape: f32[1,384], index: 4, kind: input, shape index: {}]   ;;  %s2071_s5 = inlined_call_operand.hbm [shape: bf16[384,128], index: 5, kind: input, shape index: {}]   ;;  %s2072_s6 = inlined_call_operand.vmem [shape: f32[1,128], index: 6, kind: input, shape index: {}]   ;;  %s2073_s7 = inlined_call_operand.hbm [shape: f32[16,128], index: 7, kind: output, shape index: {}]  }
   0x1   :  { %13 = vsyncpa [#allocation6], 0 }
   0x2   :  { %14 = vsyncpa [#allocation9], 0 }
   0x3   :  { %15 = vsyncpa [#allocation4], 0  ;;  %s1904_s24 = smov [#allocation5]   ;;  %s1786_s28 = scalar_lea.hbm %s2067_s1, 512 }
   0x4   :  { %s33_s25 = sshll.u32 %s1904_s24, 4  ;;  %p1787_p0 = scmp.ne.s32.totalorder %s2067_s1, %s1786_s28  ;;  %s34_s25 = int_to_ptr.vmem [resolvable:$true] %s33_s25 }
   0x5   :  { %p1790_p1 = scmp.lt.u32.totalorder %s1786_s28, %s2067_s1 }
   0x7   :  { %p1792_p2 = pnand %p1790_p1, %p1787_p0 }
   0x9   :  { %1795 = shalt.err (!%p1792_p2)
}
   0xa   :  { %s1796_s10 = scalar_lea.vmem %s34_s25, 512  ;;  %p1801_p4 = scmp.lt.s32.totalorder %s34_s25, %s34_s25 }
   0xb   :  { %p1797_p3 = scmp.ne.s32.totalorder %s34_s25, %s1796_s10  ;;  %p1802_p5 = scmp.lt.s32.totalorder %s1796_s10, %s1796_s10 }
   0xd   :  { %p1803_p6 = por %p1802_p5, %p1801_p4 }
   0xf   :  { %p1804_p7 = pnand %p1803_p6, %p1797_p3 }
  0x11   :  { %1807 = shalt.err (!%p1804_p7)
}
  0x12   :  { %s1905_s11 = smov 256   ;;  %s1906_s12 = smov 16  }
  0x13   :  { %39 = dma.hbm_to_vmem [thread:$0]  %s2067_s1, 512, %s34_s25, [#allocation6], %s1905_s11, %s1905_s11, %s1906_s12  }
  0x14   :  { %s1907_s15 = smov [#allocation2]   ;;  %s1808_s19 = scalar_lea.hbm %s2066_s0, 128 }
  0x15   :  { %s21_s16 = sshll.u32 %s1907_s15, 4  ;;  %p1809_p8 = scmp.ne.s32.totalorder %s2066_s0, %s1808_s19  ;;  %s22_s16 = int_to_ptr.vmem [resolvable:$true] %s21_s16 }
  0x16   :  { %p1812_p9 = scmp.lt.u32.totalorder %s1808_s19, %s2066_s0 }
  0x18   :  { %p1814_p10 = pnand %p1812_p9, %p1809_p8 }
  0x1a   :  { %1817 = shalt.err (!%p1814_p10)
}
  0x1b   :  { %s1818_s24 = scalar_lea.vmem %s22_s16, 128  ;;  %p1823_p12 = scmp.lt.s32.totalorder %s22_s16, %s22_s16 }
  0x1c   :  { %p1819_p11 = scmp.ne.s32.totalorder %s22_s16, %s1818_s24  ;;  %p1824_p13 = scmp.lt.s32.totalorder %s1818_s24, %s1818_s24 }
  0x1e   :  { %p1825_p0 = por %p1824_p13, %p1823_p12 }
  0x20   :  { %p1826_p1 = pnand %p1825_p0, %p1819_p11 }
  0x22   :  { %1829 = shalt.err (!%p1826_p1)
}
  0x23   :  { %s1908_s1 = smov 64   ;;  %s1909_s25 = smov 4  }
  0x24   :  { %27 = dma.hbm_to_vmem [thread:$0]  %s2066_s0, 128, %s22_s16, [#allocation3], %s1908_s1, %s1908_s1, %s1909_s25  }
  0x25   :  { %s1910_s28 = smov [#allocation7]   ;;  %s1830_s9 = scalar_lea.hbm %s2069_s3, 12288 }
  0x26   :  { %s47_s29 = sshll.u32 %s1910_s28, 4  ;;  %p1831_p2 = scmp.ne.s32.totalorder %s2069_s3, %s1830_s9  ;;  %s48_s29 = int_to_ptr.vmem [resolvable:$true] %s47_s29 }
  0x27   :  { %p1834_p3 = scmp.lt.u32.totalorder %s1830_s9, %s2069_s3 }
  0x29   :  { %p1836_p4 = pnand %p1834_p3, %p1831_p2 }
  0x2b   :  { %1839 = shalt.err (!%p1836_p4)
}
  0x2c   :  { %s1840_s14 = scalar_lea.vmem %s48_s29, 12288  ;;  %p1845_p6 = scmp.lt.s32.totalorder %s48_s29, %s48_s29 }
  0x2d   :  { %p1841_p5 = scmp.ne.s32.totalorder %s48_s29, %s1840_s14  ;;  %p1846_p7 = scmp.lt.s32.totalorder %s1840_s14, %s1840_s14 }
  0x2f   :  { %p1847_p8 = por %p1846_p7, %p1845_p6 }
  0x31   :  { %p1848_p9 = pnand %p1847_p8, %p1841_p5 }
  0x33   :  { %1851 = shalt.err (!%p1848_p9)
}
  0x34   :  { %s1911_s0 = smov 192   ;;  %s1912_s15 = smov 12  }
  0x35   :  { %53 = dma.hbm_to_vmem [thread:$0]  %s2069_s3, 12288, %s48_s29, [#allocation6], %s1911_s0, %s1911_s0, %s1912_s15  }
  0x36   :  { %s1913_s18 = smov [#allocation8]   ;;  %s1852_s22 = scalar_lea.hbm %s2071_s5, 3072 }
  0x37   :  { %s61_s19 = sshll.u32 %s1913_s18, 4  ;;  %p1853_p10 = scmp.ne.s32.totalorder %s2071_s5, %s1852_s22  ;;  %s62_s19 = int_to_ptr.vmem [resolvable:$true] %s61_s19 }
  0x38   :  { %p1856_p11 = scmp.lt.u32.totalorder %s1852_s22, %s2071_s5 }
  0x3a   :  { %p1858_p12 = pnand %p1856_p11, %p1853_p10 }
  0x3c   :  { %1861 = shalt.err (!%p1858_p12)
}
  0x3d   :  { %s1862_s28 = scalar_lea.vmem %s62_s19, 3072  ;;  %p1867_p0 = scmp.lt.s32.totalorder %s62_s19, %s62_s19 }
  0x3e   :  { %p1863_p13 = scmp.ne.s32.totalorder %s62_s19, %s1862_s28  ;;  %p1868_p1 = scmp.lt.s32.totalorder %s1862_s28, %s1862_s28 }
  0x40   :  { %p1869_p2 = por %p1868_p1, %p1867_p0 }
  0x42   :  { %p1870_p3 = pnand %p1869_p2, %p1863_p13 }
  0x44   :  { %1873 = shalt.err (!%p1870_p3)
}
  0x45   :  { %67 = dma.hbm_to_vmem [thread:$0]  %s2071_s5, 3072, %s62_s19, [#allocation9], %s1908_s1, %s1908_s1, %s1909_s25  }
  0x46   :  { %1896 = dma.done.wait [#allocation3], 128  }
  0x47   :  { %1897 = vsyncadd [#allocation3], 4294967168 }
  0x48   :  { %1898 = dma.done.wait [#allocation6], 12800  }
  0x49   :  { %1899 = vsyncadd [#allocation6], 4294954496 }
  0x4a   :  { %1900 = dma.done.wait [#allocation9], 3072  }
  0x4b   :  { %1901 = vsyncadd [#allocation9], 4294964224  ;;  %v1914_v0 = vmov 0   ;;  %v1623_v1 = vld [vmem:[#allocation5 + $0x4] ss:$16 sps:$4 sm:$0xff]   ;;  %v1626_v3 = vld [vmem:[#allocation2] sm:$0xff]   ;;  %v91_v56 = vlaneseq }
  0x4c   :  { %172 = vmatprep.mubr.bf16.mxu0 %v1914_v0  ;;  %215 = vmatprep.mubr.bf16.mxu1 %v1914_v0  ;;  %v1625_v2 = vld [vmem:[#allocation5] ss:$16 sps:$4 sm:$0xff]   ;;  %vm136_vm0 = vcmask 130048   ;;  %v1627_v4 = vld [vmem:[#allocation5 + $0xc] ss:$16 sps:$4 sm:$0xff]   ;;  %vm1916_vm1 = vmmov 0  }
  0x4d   :  { %140 = vmatprep.subr.bf16.mxu0 %v1623_v1  ;;  %v1629_v5 = vld [vmem:[#allocation5 + $0x8] ss:$16 sps:$4 sm:$0xff]   ;;  %v1630_v6 = vld [vmem:[#allocation7] ss:$12 sps:$4 sm:$0xff]   ;;  %v1632_v7 = vld [vmem:[#allocation7 + $0x4] ss:$12 sps:$4 sm:$0xff]   ;;  %183 = vmatprep.subr.bf16.mxu1 %v1627_v4 }
  0x4e   :  { %141 = vmatpush1.bf16.msra.mxu0 %v1625_v2  ;;  %184 = vmatpush1.bf16.msra.mxu1 %v1629_v5  ;;  %v1635_v8 = vld [vmem:[#allocation7 + $0x1c] ss:$12 sps:$4 sm:$0xff]   ;;  %v1633_v9 = vld [vmem:[#allocation7 + $0x18] ss:$12 sps:$4 sm:$0xff]   ;;  %v1638_v10 = vld [vmem:[#allocation7 + $0x34] ss:$12 sps:$4 sm:$0xff]  }
  0x4f   :  { %895 = vmatprep.subr.bf16.mxu0 %v1632_v7  ;;  %v1636_v11 = vld [vmem:[#allocation7 + $0x30] ss:$12 sps:$4 sm:$0xff]   ;;  %v1641_v12 = vld [vmem:[#allocation7 + $0x4c] ss:$12 sps:$4 sm:$0xff]   ;;  %v1639_v13 = vld [vmem:[#allocation7 + $0x48] ss:$12 sps:$4 sm:$0xff]  }
  0x50   :  { %v1644_v14 = vld [vmem:[#allocation7 + $0x64] ss:$12 sps:$4 sm:$0xff]   ;;  %v1657_v15 = vld [vmem:[#allocation7 + $0xc8] ss:$12 sps:$4 sm:$0xff]   ;;  %v1642_v17 = vld [vmem:[#allocation7 + $0x60] ss:$12 sps:$4 sm:$0xff]  }
  0x51   :  { %1381 = vmatmul.mubr.msk.bf16.vlgmr.msra.gmra.mrb[0].mxu0 %vm136_vm0, %v1626_v3  ;;  %1382 = vmatmul.mubr.msk.bf16.vlgmr.msra.gmra.mrb[0].mxu1 %vm136_vm0, %v1626_v3  ;;  %v1658_v16 = vld [vmem:[#allocation7 + $0x8] ss:$12 sps:$4 sm:$0xff]   ;;  %v1662_v18 = vld [vmem:[#allocation7 + $0xe0] ss:$12 sps:$4 sm:$0xff]   ;;  %v1645_v21 = vld [vmem:[#allocation7 + $0x78] ss:$12 sps:$4 sm:$0xff]  }
  0x52   :  { %896 = vmatpush1.bf16.msra.mxu0 %v1630_v6  ;;  %1504 = vmatprep.subr.bf16.mxu1 %v1657_v15  ;;  %v1663_v19 = vld [vmem:[#allocation7 + $0x20] ss:$12 sps:$4 sm:$0xff]   ;;  %v1647_v20 = vld [vmem:[#allocation7 + $0x7c] ss:$12 sps:$4 sm:$0xff]   ;;  %v1667_v22 = vld [vmem:[#allocation7 + $0xf8] ss:$12 sps:$4 sm:$0xff]  }
  0x53   :  { %897 = vmatprep.subr.bf16.mxu0 %v1635_v8  ;;  %1505 = vmatpush3.bf16.msra.mxu1 %v1658_v16  ;;  %v1668_v23 = vld [vmem:[#allocation7 + $0x38] ss:$12 sps:$4 sm:$0xff]   ;;  %v1650_v24 = vld [vmem:[#allocation7 + $0x94] ss:$12 sps:$4 sm:$0xff]   ;;  %v1672_v25 = vld [vmem:[#allocation7 + $0x110] ss:$12 sps:$4 sm:$0xff]  }
  0x54   :  { %1506 = vmatprep.subr.bf16.mxu1 %v1662_v18  ;;  %v1673_v26 = vld [vmem:[#allocation7 + $0x50] ss:$12 sps:$4 sm:$0xff]   ;;  %v1653_v28 = vld [vmem:[#allocation7 + $0xac] ss:$12 sps:$4 sm:$0xff]   ;;  %v1677_v29 = vld [vmem:[#allocation7 + $0x128] ss:$12 sps:$4 sm:$0xff]  }
  0x55   :  { %v1648_v27 = vld [vmem:[#allocation7 + $0x90] ss:$12 sps:$4 sm:$0xff]   ;;  %v1651_v30 = vld [vmem:[#allocation7 + $0xa8] ss:$12 sps:$4 sm:$0xff]   ;;  %v1682_v33 = vld [vmem:[#allocation7 + $0x140] ss:$12 sps:$4 sm:$0xff]  }
  0x56   :  { %898 = vmatpush1.bf16.msra.mxu0 %v1633_v9  ;;  %v1678_v31 = vld [vmem:[#allocation7 + $0x68] ss:$12 sps:$4 sm:$0xff]   ;;  %v1656_v32 = vld [vmem:[#allocation7 + $0xc4] ss:$12 sps:$4 sm:$0xff]   ;;  %v1654_v34 = vld [vmem:[#allocation7 + $0xc0] ss:$12 sps:$4 sm:$0xff]  }
  0x57   :  { %899 = vmatprep.subr.bf16.mxu0 %v1638_v10  ;;  %1507 = vmatpush3.bf16.msra.mxu1 %v1663_v19  ;;  %v1683_v35 = vld [vmem:[#allocation7 + $0x80] ss:$12 sps:$4 sm:$0xff]   ;;  %v1661_v36 = vld [vmem:[#allocation7 + $0xdc] ss:$12 sps:$4 sm:$0xff]   ;;  %v1659_v37 = vld [vmem:[#allocation7 + $0xd8] ss:$12 sps:$4 sm:$0xff]  }
  0x58   :  { %1508 = vmatprep.subr.bf16.mxu1 %v1667_v22  ;;  %v1666_v38 = vld [vmem:[#allocation7 + $0xf4] ss:$12 sps:$4 sm:$0xff]   ;;  %v1664_v39 = vld [vmem:[#allocation7 + $0xf0] ss:$12 sps:$4 sm:$0xff]   ;;  %v1671_v40 = vld [vmem:[#allocation7 + $0x10c] ss:$12 sps:$4 sm:$0xff]  }
  0x59   :  { %v1669_v41 = vld [vmem:[#allocation7 + $0x108] ss:$12 sps:$4 sm:$0xff]   ;;  %v1676_v42 = vld [vmem:[#allocation7 + $0x124] ss:$12 sps:$4 sm:$0xff]   ;;  %v1674_v43 = vld [vmem:[#allocation7 + $0x120] ss:$12 sps:$4 sm:$0xff]  }
  0x5a   :  { %900 = vmatpush1.bf16.msra.mxu0 %v1636_v11  ;;  %v1681_v44 = vld [vmem:[#allocation7 + $0x13c] ss:$12 sps:$4 sm:$0xff]   ;;  %v1679_v45 = vld [vmem:[#allocation7 + $0x138] ss:$12 sps:$4 sm:$0xff]   ;;  %v1686_v46 = vld [vmem:[#allocation7 + $0x154] ss:$12 sps:$4 sm:$0xff]  }
  0x5b   :  { %901 = vmatprep.subr.bf16.mxu0 %v1641_v12  ;;  %1509 = vmatpush3.bf16.msra.mxu1 %v1668_v23  ;;  %v1687_v47 = vld [vmem:[#allocation7 + $0x158] ss:$12 sps:$4 sm:$0xff]   ;;  %v1684_v48 = vld [vmem:[#allocation7 + $0x150] ss:$12 sps:$4 sm:$0xff]   ;;  %v1689_v52 = vld [vmem:[#allocation7 + $0x168] ss:$12 sps:$4 sm:$0xff]  }
  0x5c   :  { %1510 = vmatprep.subr.bf16.mxu1 %v1672_v25  ;;  %v1688_v49 = vld [vmem:[#allocation7 + $0x98] ss:$12 sps:$4 sm:$0xff]   ;;  %v1692_v51 = vld [vmem:[#allocation7 + $0x170] ss:$12 sps:$4 sm:$0xff]   ;;  %v1697_v55 = vld [vmem:[#allocation7 + $0x248] ss:$12 sps:$4 sm:$0xff]  }
  0x5d   :  { %v1691_v50 = vld [vmem:[#allocation7 + $0x16c] ss:$12 sps:$4 sm:$0xff]   ;;  %v1693_v53 = vld [vmem:[#allocation7 + $0xb0] ss:$12 sps:$4 sm:$0xff]   ;;  %v2014_v57 = vshrl.u32 %v91_v56, 7  ;;  %s1917_s8 = smov [#allocation10]  }
  0x5e   :  { %902 = vmatpush1.bf16.msra.mxu0 %v1639_v13  ;;  %v1696_v54 = vld [vmem:[#allocation7 + $0x184] ss:$12 sps:$4 sm:$0xff]   ;;  %v89_v59 = vld [vmem:[%s2068_s2] sm:$0xf]  ;;  %s1362_s9 = sshll.u32 %s1917_s8, 4  ;;  %s1363_s9 = int_to_ptr.vmem [resolvable:$true] %s1362_s9 }
  0x5f   :  { %903 = vmatprep.subr.bf16.mxu0 %v1644_v14  ;;  %1511 = vmatpush3.bf16.msra.mxu1 %v1673_v26  ;;  %v93_v58 = vsub.s32 0, %v2014_v57  ;;  %v97_v60 = vsub.s32 1, %v2014_v57  ;;  %v101_v61 = vsub.s32 2, %v2014_v57  ;;  %v105_v63 = vsub.s32 3, %v2014_v57  ;;  %v1728_v56 = vld [vmem:[#allocation7 + $0x218] ss:$12 sps:$4 sm:$0xff]   ;;  %p1879_p5 = scmp.lt.s32.totalorder %s1363_s9, %s1363_s9 }
  0x60   :  { %1512 = vmatprep.subr.bf16.mxu1 %v1677_v29  ;;  %v1775_v57 = vld [vmem:[#allocation8 + $0x88] sm:$0xff]   ;;  %s1874_s10 = scalar_lea.vmem %s1363_s9, 256 }
  0x61   :  { %v94_v62 = vrot.slane %v89_v59, %v93_v58  ;;  %v98_v0 = vrot.slane %v89_v59, %v97_v60  ;;  %v102_v2 = vrot.slane %v89_v59, %v101_v61  ;;  %v106_v5 = vrot.slane %v89_v59, %v105_v63  ;;  %v1731_v59 = vld [vmem:[#allocation7 + $0x22c] ss:$12 sps:$4 sm:$0xff]   ;;  %v1729_v63 = vld [vmem:[#allocation7 + $0x228] ss:$12 sps:$4 sm:$0xff]   ;;  %p1875_p4 = scmp.ne.s32.totalorder %s1363_s9, %s1874_s10  ;;  %p1880_p6 = scmp.lt.s32.totalorder %s1874_s10, %s1874_s10 }
  0x62   :  { %904 = vmatpush1.bf16.msra.mxu0 %v1642_v17 }
  0x63   :  { %905 = vmatprep.subr.bf16.mxu0 %v1647_v20  ;;  %1513 = vmatpush3.bf16.msra.mxu1 %v1678_v31  ;;  %v1702_v31 = vld [vmem:[#allocation7 + $0x260] ss:$12 sps:$4 sm:$0xff]   ;;  %p1881_p7 = por %p1880_p6, %p1879_p5 }
  0x64   :  { %1514 = vmatprep.subr.bf16.mxu1 %v1682_v33 }
  0x65   :  { %p1882_p8 = pnand %p1881_p7, %p1875_p4 }
  0x66   :  { %906 = vmatpush1.bf16.msra.mxu0 %v1645_v21 }
  0x67   :  { %907 = vmatprep.subr.bf16.mxu0 %v1650_v24  ;;  %1515 = vmatpush3.bf16.msra.mxu1 %v1683_v35  ;;  %v1699_v35 = vld [vmem:[#allocation7 + $0x198] ss:$12 sps:$4 sm:$0xff]  }
  0x68   :  { %1516 = vmatprep.subr.bf16.mxu1 %v1687_v47  ;;  %v1714_v47 = vld [vmem:[#allocation7 + $0x1e0] ss:$12 sps:$4 sm:$0xff]  }
  0x6a   :  { %908 = vmatpush1.bf16.msra.mxu0 %v1648_v27  ;;  %v1694_v27 = vld [vmem:[#allocation7 + $0x180] ss:$12 sps:$4 sm:$0xff]  }
  0x6b   :  { %909 = vmatprep.subr.bf16.mxu0 %v1653_v28  ;;  %1517 = vmatpush3.bf16.msra.mxu1 %v1688_v49  ;;  %v1698_v28 = vld [vmem:[#allocation7 + $0x188] ss:$12 sps:$4 sm:$0xff]  }
  0x6c   :  { %1518 = vmatprep.subr.bf16.mxu1 %v1692_v51  ;;  %v1721_v49 = vld [vmem:[#allocation7 + $0x1fc] ss:$12 sps:$4 sm:$0xff]   ;;  %v1719_v51 = vld [vmem:[#allocation7 + $0x1f8] ss:$12 sps:$4 sm:$0xff]  }
  0x6e   :  { %910 = vmatpush1.bf16.msra.mxu0 %v1651_v30  ;;  %v1701_v30 = vld [vmem:[#allocation7 + $0x19c] ss:$12 sps:$4 sm:$0xff]  }
  0x6f   :  { %911 = vmatprep.subr.bf16.mxu0 %v1656_v32  ;;  %1519 = vmatpush3.bf16.msra.mxu1 %v1693_v53  ;;  %v1726_v53 = vld [vmem:[#allocation7 + $0x214] ss:$12 sps:$4 sm:$0xff]  }
  0x70   :  { %1526 = vmatprep.subr.bf16.mxu1 %v1697_v55  ;;  %v1724_v55 = vld [vmem:[#allocation7 + $0x210] ss:$12 sps:$4 sm:$0xff]  }
  0x72   :  { %912 = vmatpush1.bf16.msra.mxu0 %v1654_v34 }
  0x73   :  { %913 = vmatprep.subr.bf16.mxu0 %v1661_v36  ;;  %v1703_v36 = vld [vmem:[#allocation7 + $0x1a0] ss:$12 sps:$4 sm:$0xff]  }
  0x76   :  { %914 = vmatpush1.bf16.msra.mxu0 %v1659_v37  ;;  %v1706_v37 = vld [vmem:[#allocation7 + $0x1b4] ss:$12 sps:$4 sm:$0xff]  }
  0x77   :  { %915 = vmatprep.subr.bf16.mxu0 %v1666_v38  ;;  %v1707_v38 = vld [vmem:[#allocation7 + $0x278] ss:$12 sps:$4 sm:$0xff]  }
  0x7a   :  { %916 = vmatpush1.bf16.msra.mxu0 %v1664_v39  ;;  %v1704_v39 = vld [vmem:[#allocation7 + $0x1b0] ss:$12 sps:$4 sm:$0xff]  }
  0x7b   :  { %917 = vmatprep.subr.bf16.mxu0 %v1671_v40  ;;  %v1708_v40 = vld [vmem:[#allocation7 + $0x1b8] ss:$12 sps:$4 sm:$0xff]  }
  0x7e   :  { %918 = vmatpush1.bf16.msra.mxu0 %v1669_v41  ;;  %v1711_v41 = vld [vmem:[#allocation7 + $0x1cc] ss:$12 sps:$4 sm:$0xff]  }
  0x7f   :  { %919 = vmatprep.subr.bf16.mxu0 %v1676_v42  ;;  %v1712_v42 = vld [vmem:[#allocation7 + $0x290] ss:$12 sps:$4 sm:$0xff]  }
  0x82   :  { %920 = vmatpush1.bf16.msra.mxu0 %v1674_v43  ;;  %v1709_v43 = vld [vmem:[#allocation7 + $0x1c8] ss:$12 sps:$4 sm:$0xff]  }
  0x83   :  { %921 = vmatprep.subr.bf16.mxu0 %v1681_v44  ;;  %v1713_v44 = vld [vmem:[#allocation7 + $0x1d0] ss:$12 sps:$4 sm:$0xff]  }
  0x86   :  { %922 = vmatpush1.bf16.msra.mxu0 %v1679_v45  ;;  %v1716_v45 = vld [vmem:[#allocation7 + $0x1e4] ss:$12 sps:$4 sm:$0xff]  }
  0x87   :  { %923 = vmatprep.subr.bf16.mxu0 %v1686_v46  ;;  %v1717_v46 = vld [vmem:[#allocation7 + $0x2a8] ss:$12 sps:$4 sm:$0xff]  }
  0x8a   :  { %924 = vmatpush1.bf16.msra.mxu0 %v1684_v48  ;;  %v1718_v48 = vld [vmem:[#allocation7 + $0x1e8] ss:$12 sps:$4 sm:$0xff]  }
  0x8b   :  { %925 = vmatprep.subr.bf16.mxu0 %v1691_v50  ;;  %v1722_v50 = vld [vmem:[#allocation7 + $0x2c0] ss:$12 sps:$4 sm:$0xff]  }
  0x8e   :  { %926 = vmatpush1.bf16.msra.mxu0 %v1689_v52  ;;  %v1723_v52 = vld [vmem:[#allocation7 + $0x200] ss:$12 sps:$4 sm:$0xff]  }
  0x8f   :  { %938 = vmatprep.subr.bf16.mxu0 %v1696_v54  ;;  %v1727_v54 = vld [vmem:[#allocation7 + $0x2d8] ss:$12 sps:$4 sm:$0xff]  }
 0x124   :  { %v174_v1 = vpop.f32.mrb[0].mxu0  ;;  %v217_v10 = vpop.f32.mrb[0].mxu1 }
 0x125   :  { %v175_v3 = vadd.f32 %v174_v1, %v94_v62  ;;  %v176_v4 = vpop.f32.mrb[1].mxu0  ;;  %v218_v12 = vadd.f32 %v217_v10, %v102_v2  ;;  %v219_v13 = vpop.f32.mrb[1].mxu1  ;;  %v1736_v1 = vld [vmem:[#allocation7 + $0x244] ss:$12 sps:$4 sm:$0xff]   ;;  %v1746_v10 = vld [vmem:[#allocation7 + $0x2a0] ss:$12 sps:$4 sm:$0xff]  }
 0x126   :  { %v177_v6 = vadd.f32 %v176_v4, %v98_v0  ;;  %v178_v7 = vpop.f32.mrb[2].mxu0  ;;  %v220_v16 = vadd.f32 %v219_v13, %v106_v5  ;;  %v221_v17 = vpop.f32.mrb[2].mxu1  ;;  %v1737_v4 = vld [vmem:[#allocation7 + $0x258] ss:$12 sps:$4 sm:$0xff]   ;;  %v1754_v13 = vld [vmem:[#allocation7 + $0x2d4] ss:$12 sps:$4 sm:$0xff]  }
 0x127   :  { %v179_v8 = vadd.f32 %v178_v7, %v94_v62  ;;  %v180_v9 = vpop.f32.mrb[3].mxu0  ;;  %v226_v14 = vmax.f32 %v175_v3, 0.0  ;;  %v228_v20 = vmax.f32 %v218_v12, 0.0  ;;  %v222_v21 = vadd.f32 %v221_v17, %v102_v2  ;;  %v223_v22 = vpop.f32.mrb[3].mxu1  ;;  %v1732_v62 = vld [vmem:[#allocation7 + $0x2f0] ss:$12 sps:$4 sm:$0xff]  }
 0x128   :  { %v181_v11 = vadd.f32 %v180_v9, %v98_v0  ;;  %v227_v18 = vmax.f32 %v177_v6, 0.0  ;;  %v229_v24 = vmax.f32 %v220_v16, 0.0  ;;  %v224_v25 = vadd.f32 %v223_v22, %v106_v5  ;;  %v1733_v0 = vld [vmem:[#allocation7 + $0x230] ss:$12 sps:$4 sm:$0xff]   ;;  %v1734_v2 = vld [vmem:[#allocation7 + $0x240] ss:$12 sps:$4 sm:$0xff]  }
 0x129   :  { %v230_v15 = vmax.f32 %v179_v8, 0.0  ;;  %v232_v29 = vmax.f32 %v222_v21, 0.0  ;;  %v1739_v3 = vld [vmem:[#allocation7 + $0x25c] ss:$12 sps:$4 sm:$0xff]   ;;  %v1742_v5 = vld [vmem:[#allocation7 + $0x274] ss:$12 sps:$4 sm:$0xff]  }
 0x12a   :  { %v231_v19 = vmax.f32 %v181_v11, 0.0  ;;  %v233_v32 = vmax.f32 %v224_v25, 0.0  ;;  %v1740_v6 = vld [vmem:[#allocation7 + $0x270] ss:$12 sps:$4 sm:$0xff]   ;;  %v1745_v7 = vld [vmem:[#allocation7 + $0x28c] ss:$12 sps:$4 sm:$0xff]  }
 0x12b   :  { %v234_v23 = vpack.c.bf16 %v230_v15, %v226_v14  ;;  %v2029_v33 = vpack.c.bf16 %v232_v29, %v228_v20  ;;  %v1743_v8 = vld [vmem:[#allocation7 + $0x288] ss:$12 sps:$4 sm:$0xff]   ;;  %v1748_v9 = vld [vmem:[#allocation7 + $0x2a4] ss:$12 sps:$4 sm:$0xff]   ;;  %v1757_v15 = vld [vmem:[#allocation7 + $0x2ec] ss:$12 sps:$4 sm:$0xff]  }
 0x12c   :  { %v235_v26 = vpack.c.bf16 %v231_v19, %v227_v18  ;;  %v237_v34 = vpack.c.bf16 %v233_v32, %v229_v24  ;;  %v1751_v11 = vld [vmem:[#allocation7 + $0x2bc] ss:$12 sps:$4 sm:$0xff]   ;;  %v1749_v12 = vld [vmem:[#allocation7 + $0x2b8] ss:$12 sps:$4 sm:$0xff]   ;;  %v1762_v21 = vld [vmem:[#allocation8 + $0x50] sm:$0xff]  }
 0x12d   :  { %v1752_v14 = vld [vmem:[#allocation7 + $0x2d0] ss:$12 sps:$4 sm:$0xff]   ;;  %v1755_v16 = vld [vmem:[#allocation7 + $0x2e8] ss:$12 sps:$4 sm:$0xff]   ;;  %v1758_v17 = vld [vmem:[#allocation8 + $0x40] sm:$0xff]  }
 0x12e   :  { %927 = vmatprep.mubr.bf16.mxu0 %v235_v26  ;;  %1013 = vmatprep.mubr.bf16.mxu1 %v235_v26  ;;  %v1759_v18 = vld [vmem:[#allocation8] sm:$0xff]   ;;  %v1760_v19 = vld [vmem:[#allocation8 + $0x48] sm:$0xff]   ;;  %v1763_v22 = vld [vmem:[#allocation8 + $0x10] sm:$0xff]  }
 0x12f   :  { %928 = vmatmul.mubr.bf16.vlgmr.msra.gmra.mrb[4].mxu0 %v234_v23  ;;  %1014 = vmatmul.mubr.bf16.vlgmr.msra.gmra.mrb[4].mxu1 %v234_v23  ;;  %v1761_v20 = vld [vmem:[#allocation8 + $0x8] sm:$0xff]   ;;  %v1764_v23 = vld [vmem:[#allocation8 + $0x58] sm:$0xff]   ;;  %v1766_v25 = vld [vmem:[#allocation8 + $0x60] sm:$0xff]  }
 0x130   :  { %939 = vmatpush1.bf16.msra.mxu0 %v1694_v27  ;;  %1527 = vmatpush3.bf16.msra.mxu1 %v1698_v28  ;;  %v1765_v24 = vld [vmem:[#allocation8 + $0x18] sm:$0xff]   ;;  %v1767_v26 = vld [vmem:[#allocation8 + $0x20] sm:$0xff]   ;;  %v1768_v27 = vld [vmem:[#allocation8 + $0x68] sm:$0xff]  }
 0x131   :  { %940 = vmatprep.subr.bf16.mxu0 %v1701_v30  ;;  %1528 = vmatprep.subr.bf16.mxu1 %v1702_v31  ;;  %v1769_v28 = vld [vmem:[#allocation8 + $0x28] sm:$0xff]   ;;  %v1770_v29 = vld [vmem:[#allocation8 + $0x70] sm:$0xff]   ;;  %v1772_v31 = vld [vmem:[#allocation8 + $0x78] sm:$0xff]  }
 0x132   :  { %1054 = vmatprep.mubr.bf16.mxu1 %v237_v34  ;;  %970 = vmatprep.mubr.bf16.mxu0 %v237_v34  ;;  %v1771_v30 = vld [vmem:[#allocation8 + $0x30] sm:$0xff]   ;;  %v1773_v32 = vld [vmem:[#allocation8 + $0x38] sm:$0xff]  }
 0x134   :  { %941 = vmatpush1.bf16.msra.mxu0 %v1699_v35  ;;  %1529 = vmatpush3.bf16.msra.mxu1 %v1703_v36 }
 0x135   :  { %942 = vmatprep.subr.bf16.mxu0 %v1706_v37  ;;  %1530 = vmatprep.subr.bf16.mxu1 %v1707_v38 }
 0x138   :  { %943 = vmatpush1.bf16.msra.mxu0 %v1704_v39  ;;  %1531 = vmatpush3.bf16.msra.mxu1 %v1708_v40  ;;  %v366_v40 = vld [vmem:[%s2070_s4] sm:$0x7] }
 0x139   :  { %944 = vmatprep.subr.bf16.mxu0 %v1711_v41  ;;  %1532 = vmatprep.subr.bf16.mxu1 %v1712_v42  ;;  %v379_v41 = vrot.slane %v366_v40, %v101_v61 }
 0x13c   :  { %945 = vmatpush1.bf16.msra.mxu0 %v1709_v43  ;;  %1533 = vmatpush3.bf16.msra.mxu1 %v1713_v44 }
 0x13d   :  { %946 = vmatprep.subr.bf16.mxu0 %v1716_v45  ;;  %1534 = vmatprep.subr.bf16.mxu1 %v1717_v46 }
 0x140   :  { %947 = vmatpush1.bf16.msra.mxu0 %v1714_v47  ;;  %1535 = vmatpush3.bf16.msra.mxu1 %v1718_v48 }
 0x141   :  { %948 = vmatprep.subr.bf16.mxu0 %v1721_v49  ;;  %1536 = vmatprep.subr.bf16.mxu1 %v1722_v50 }
 0x144   :  { %949 = vmatpush1.bf16.msra.mxu0 %v1719_v51  ;;  %1537 = vmatpush3.bf16.msra.mxu1 %v1723_v52 }
 0x145   :  { %950 = vmatprep.subr.bf16.mxu0 %v1726_v53  ;;  %1538 = vmatprep.subr.bf16.mxu1 %v1727_v54 }
 0x148   :  { %951 = vmatpush1.bf16.msra.mxu0 %v1724_v55  ;;  %1539 = vmatpush3.bf16.msra.mxu1 %v1728_v56  ;;  %v371_v55 = vrot.slane %v366_v40, %v93_v58  ;;  %v375_v56 = vrot.slane %v366_v40, %v97_v60  ;;  %v1776_v58 = vld [vmem:[#allocation8 + $0x90] sm:$0xff]   ;;  %v1777_v60 = vld [vmem:[#allocation8 + $0x98] sm:$0xff]  }
 0x149   :  { %952 = vmatprep.subr.bf16.mxu0 %v1731_v59  ;;  %1540 = vmatprep.subr.bf16.mxu1 %v1732_v62 }
 0x14c   :  { %953 = vmatpush1.bf16.msra.mxu0 %v1729_v63  ;;  %1541 = vmatpush3.bf16.msra.mxu1 %v1733_v0 }
 0x14d   :  { %954 = vmatprep.subr.bf16.mxu0 %v1736_v1  ;;  %1548 = vmatprep.subr.bf16.mxu1 %v1758_v17 }
 0x14f   :  { %1055 = vmatmul.mubr.bf16.vlgmr.msra.gmra.mrb[8].mxu1 %v2029_v33 }
 0x150   :  { %955 = vmatpush1.bf16.msra.mxu0 %v1734_v2  ;;  %1549 = vmatpush3.bf16.msra.mxu1 %v1759_v18 }
 0x151   :  { %956 = vmatprep.subr.bf16.mxu0 %v1739_v3  ;;  %1550 = vmatprep.subr.bf16.mxu1 %v1760_v19 }
 0x154   :  { %957 = vmatpush1.bf16.msra.mxu0 %v1737_v4  ;;  %1551 = vmatpush3.bf16.msra.mxu1 %v1761_v20 }
 0x155   :  { %958 = vmatprep.subr.bf16.mxu0 %v1742_v5  ;;  %1552 = vmatprep.subr.bf16.mxu1 %v1762_v21  ;;  %v1479_v21 = vld [vmem:[%s2072_s6] ss:$0 sm:$0xff] }
 0x158   :  { %959 = vmatpush1.bf16.msra.mxu0 %v1740_v6  ;;  %1553 = vmatpush3.bf16.msra.mxu1 %v1763_v22 }
 0x159   :  { %960 = vmatprep.subr.bf16.mxu0 %v1745_v7  ;;  %1554 = vmatprep.subr.bf16.mxu1 %v1764_v23 }
 0x15c   :  { %961 = vmatpush1.bf16.msra.mxu0 %v1743_v8  ;;  %1555 = vmatpush3.bf16.msra.mxu1 %v1765_v24 }
 0x15d   :  { %962 = vmatprep.subr.bf16.mxu0 %v1748_v9  ;;  %1556 = vmatprep.subr.bf16.mxu1 %v1766_v25 }
 0x160   :  { %963 = vmatpush1.bf16.msra.mxu0 %v1746_v10  ;;  %1557 = vmatpush3.bf16.msra.mxu1 %v1767_v26  ;;  %v1774_v10 = vld [vmem:[#allocation8 + $0x80] sm:$0xff]  }
 0x161   :  { %964 = vmatprep.subr.bf16.mxu0 %v1751_v11  ;;  %1558 = vmatprep.subr.bf16.mxu1 %v1768_v27  ;;  %v1778_v11 = vld [vmem:[#allocation8 + $0xa0] sm:$0xff]  }
 0x164   :  { %965 = vmatpush1.bf16.msra.mxu0 %v1749_v12  ;;  %1559 = vmatpush3.bf16.msra.mxu1 %v1769_v28  ;;  %v1779_v12 = vld [vmem:[#allocation8 + $0xa8] sm:$0xff]  }
 0x165   :  { %966 = vmatprep.subr.bf16.mxu0 %v1754_v13  ;;  %1560 = vmatprep.subr.bf16.mxu1 %v1770_v29  ;;  %v1780_v13 = vld [vmem:[#allocation8 + $0xb0] sm:$0xff]  }
 0x168   :  { %967 = vmatpush1.bf16.msra.mxu0 %v1752_v14  ;;  %1561 = vmatpush3.bf16.msra.mxu1 %v1771_v30  ;;  %v1781_v14 = vld [vmem:[#allocation8 + $0xb8] sm:$0xff]  }
 0x169   :  { %968 = vmatprep.subr.bf16.mxu0 %v1757_v15  ;;  %1562 = vmatprep.subr.bf16.mxu1 %v1772_v31 }
 0x16c   :  { %969 = vmatpush1.bf16.msra.mxu0 %v1755_v16  ;;  %1563 = vmatpush3.bf16.msra.mxu1 %v1773_v32 }
 0x16f   :  { %971 = vmatmul.mubr.bf16.vlgmr.msra.gmra.mrb[4].mxu0 %v2029_v33  ;;  %v1915_v33 = vmov 0.0  }
 0x170   :  { %1579 = vmatprep.subr.bf16.mxu1 %v1915_v33 }
 0x202   :  { %v1520_v34 = vpop.f32.mrb[4].mxu1 }
 0x203   :  { %v1521_v35 = vpop.f32.mrb[5].mxu1 }
 0x204   :  { %v1522_v36 = vadd.f32 %v1521_v35, %v1520_v34  ;;  %v1523_v37 = vpop.f32.mrb[6].mxu1 }
 0x205   :  { %v1524_v38 = vpop.f32.mrb[7].mxu1 }
 0x206   :  { %v1525_v39 = vadd.f32 %v1524_v38, %v1523_v37  ;;  %v1016_v44 = vadd.f32 %v1522_v36, %v379_v41 }
 0x208   :  { %v1019_v48 = vadd.f32 %v1525_v39, %v379_v41 }
 0x222   :  { %v1542_v42 = vpop.f32.mrb[8].mxu1 }
 0x223   :  { %v1543_v43 = vpop.f32.mrb[9].mxu1 }
 0x224   :  { %v1544_v45 = vadd.f32 %v1543_v43, %v1542_v42  ;;  %v1545_v46 = vpop.f32.mrb[10].mxu1 }
 0x225   :  { %v1546_v47 = vpop.f32.mrb[11].mxu1 }
 0x226   :  { %v1057_v49 = vadd.f32 %v1544_v45, %v1016_v44  ;;  %v1547_v50 = vadd.f32 %v1546_v47, %v1545_v46 }
 0x228   :  { %v1060_v51 = vadd.f32 %v1547_v50, %v1019_v48  ;;  %v1065_v52 = vmax.f32 %v1057_v49, 0.0 }
 0x22a   :  { %v1068_v53 = vmax.f32 %v1060_v51, 0.0 }
 0x22c   :  { %v1071_v54 = vpack.c.bf16 %v1068_v53, %v1065_v52 }
 0x242   :  { %v972_v61 = vpop.f32.mrb[4].mxu0 }
 0x243   :  { %v1599_v59 = vadd.f32 %v972_v61, %v371_v55  ;;  %v974_v62 = vpop.f32.mrb[5].mxu0 }
 0x244   :  { %v1600_v63 = vadd.f32 %v974_v62, %v375_v56  ;;  %v976_v0 = vpop.f32.mrb[6].mxu0 }
 0x245   :  { %v1601_v1 = vadd.f32 %v976_v0, %v371_v55  ;;  %v978_v2 = vpop.f32.mrb[7].mxu0  ;;  %v1063_v4 = vmax.f32 %v1599_v59, 0.0 }
 0x246   :  { %v1602_v3 = vadd.f32 %v978_v2, %v375_v56  ;;  %v1064_v6 = vmax.f32 %v1600_v63, 0.0 }
 0x247   :  { %v1066_v5 = vmax.f32 %v1601_v1, 0.0 }
 0x248   :  { %v1067_v7 = vmax.f32 %v1602_v3, 0.0 }
 0x249   :  { %v1069_v8 = vpack.c.bf16 %v1066_v5, %v1063_v4 }
 0x24a   :  { %v1070_v9 = vpack.c.bf16 %v1067_v7, %v1064_v6 }
 0x24c   :  { %1303 = vmatprep.mubr.bf16.mxu1 %v1070_v9 }
 0x24d   :  { %1304 = vmatmul.mubr.bf16.vlgmr.msra.gmra.mrb[12].mxu1 %v1069_v8 }
 0x24e   :  { %1580 = vmatpush3.bf16.msra.mxu1 %v1774_v10  ;;  %1595 = vmatprep.mubr.msk.bf16.mxu1 %vm1916_vm1, %v1915_v33 }
 0x24f   :  { %1581 = vmatprep.subr.bf16.mxu1 %v1915_v33 }
 0x252   :  { %1582 = vmatpush3.bf16.msra.mxu1 %v1775_v57 }
 0x253   :  { %1583 = vmatprep.subr.bf16.mxu1 %v1915_v33 }
 0x256   :  { %1584 = vmatpush3.bf16.msra.mxu1 %v1776_v58 }
 0x257   :  { %1585 = vmatprep.subr.bf16.mxu1 %v1915_v33 }
 0x25a   :  { %1586 = vmatpush3.bf16.msra.mxu1 %v1777_v60 }
 0x25b   :  { %1587 = vmatprep.subr.bf16.mxu1 %v1915_v33 }
 0x25e   :  { %1588 = vmatpush3.bf16.msra.mxu1 %v1778_v11 }
 0x25f   :  { %1589 = vmatprep.subr.bf16.mxu1 %v1915_v33 }
 0x262   :  { %1590 = vmatpush3.bf16.msra.mxu1 %v1779_v12 }
 0x263   :  { %1591 = vmatprep.subr.bf16.mxu1 %v1915_v33 }
 0x266   :  { %1592 = vmatpush3.bf16.msra.mxu1 %v1780_v13 }
 0x267   :  { %1593 = vmatprep.subr.bf16.mxu1 %v1915_v33 }
 0x26a   :  { %1594 = vmatpush3.bf16.msra.mxu1 %v1781_v14 }
 0x26d   :  { %1596 = vmatmul.mubr.bf16.vlgmr.msra.gmra.mrb[16].mxu1 %v1071_v54 }
 0x320   :  { %v1564_v15 = vpop.f32.mrb[12].mxu1 }
 0x321   :  { %v1565_v16 = vpop.f32.mrb[13].mxu1 }
 0x322   :  { %v1566_v17 = vadd.f32 %v1565_v16, %v1564_v15  ;;  %v1567_v18 = vpop.f32.mrb[14].mxu1 }
 0x323   :  { %v1568_v19 = vpop.f32.mrb[15].mxu1 }
 0x324   :  { %v1569_v20 = vadd.f32 %v1568_v19, %v1567_v18  ;;  %v1306_v22 = vadd.f32 %v1566_v17, %v1479_v21 }
 0x326   :  { %v1309_v26 = vadd.f32 %v1569_v20, %v1479_v21 }
 0x340   :  { %v1346_v23 = vpop.f32.mrb[16].mxu1 }
 0x341   :  { %v1347_v24 = vadd.f32 %v1346_v23, %v1306_v22  ;;  %v1597_v25 = vpop.f32.mrb[17].mxu1 }
 0x342   :  { %v1349_v27 = vpop.f32.mrb[18].mxu1 }
 0x343   :  { %1782 = vtanh.f32 %v1347_v24  ;;  %v1350_v28 = vadd.f32 %v1349_v27, %v1309_v26  ;;  %v1598_v29 = vpop.f32.mrb[19].mxu1 }
 0x345   :  { %1784 = vtanh.f32 %v1350_v28 }
 0x34d   :  { %v1783_v30 = vpop.eup %1782 }
 0x34e   :  { %1355 = vst [vmem:[#allocation10] sm:$0xff] %v1783_v30 }
 0x34f   :  { %v1785_v31 = vpop.eup %1784 }
 0x350   :  { %1356 = vst [vmem:[#allocation10 + $0x8] sm:$0xff] %v1785_v31 }
 0x351   :  { %1885 = shalt.err (!%p1882_p8)
}
 0x352   :  { %s1886_s12 = scalar_lea.hbm %s2073_s7, 256 }
 0x353   :  { %p1887_p9 = scmp.ne.s32.totalorder %s2073_s7, %s1886_s12  ;;  %p1890_p10 = scmp.lt.u32.totalorder %s1886_s12, %s2073_s7 }
 0x355   :  { %p1892_p11 = pnand %p1890_p10, %p1887_p9 }
 0x357   :  { %1895 = shalt.err (!%p1892_p11)
}
 0x358   :  { %s1918_s16 = smov 128   ;;  %s1919_s17 = smov 8  }
 0x359   :  { %1368 = dma.vmem_to_hbm [thread:$0]  %s1363_s9, 256, %s2073_s7, [#allocation4], %s1918_s16, %s1918_s16, %s1919_s17  }
 0x35a   :  { %1902 = dma.done.wait [#allocation4], 256  }
 0x35b   :  { %1903 = vsyncadd [#allocation4], 4294967040 }
 0x35c   :  { %1372 = vsyncpa [#allocation3], 1 }
 0x35d   :  { %1373 = vsyncpa [#allocation6], 1 }
 0x35e   :  { %1374 = vsyncpa [#allocation9], 1 }
 0x35f   :  { %1375 = vsyncpa [#allocation4], 1 }

</bundles_post_ra>
